<compile_context>
chip_gen: v6e
topology: v6e:2x2x1
jax: 0.10.0
libtpu: 0.0.40
codegen_flags: <defaults>
</compile_context>

<pallas_src>
import functools

import jax
import jax.numpy as jnp
from jax.experimental import pallas as pl
from jax.experimental.pallas import tpu as pltpu


def _charbonnier_kernel(x_ref, y_ref, acc_ref, *, eps):
    # acc_ref: (1, 8, 128) f32 output block, resident in VMEM across the
    # reduction axis (same block index for every step of axis 1).
    @pl.when(pl.program_id(1) == 0)
    def _():
        acc_ref[...] = jnp.zeros_like(acc_ref)

    diff = x_ref[...].astype(jnp.float32) - y_ref[...].astype(jnp.float32)
    part = jnp.sqrt(diff * diff + eps)  # (block_rows, 128); sqrt -> EUP slot
    # Fold down to one vreg of partial sums with pure VPU adds (no per-step
    # cross-lane XLU reduce, no masked scalar store).
    acc_ref[...] += part.reshape(-1, 8, 128).sum(axis=0)[None]


def charbonnier_loss(x, y, eps=1e-6, *, target_block_rows=2048):
    """sum(sqrt((x - y)^2 + eps)) over all elements of x, y (same shape)."""
    assert x.shape == y.shape
    lanes = 128
    n = x.size

    # Tile size: target ~1 MiB per input tile (2048 x 128 f32), clamped to the
    # input size and rounded to a multiple of 8 sublanes.
    rows_needed = -(-n // lanes)  # cdiv
    block_rows = min(int(target_block_rows), max(8, ((rows_needed + 7) // 8) * 8))
    tile_elems = block_rows * lanes

    # The reduction is layout-agnostic: flatten to a lane-dense (rows, 128)
    # slab. Only pad (HBM round-trip copy) when not already tile-aligned.
    n_pad = (-n) % tile_elems
    xf = x.reshape(-1)
    yf = y.reshape(-1)
    if n_pad:
        xf = jnp.pad(xf, (0, n_pad))
        yf = jnp.pad(yf, (0, n_pad))
    rows = (n + n_pad) // lanes
    xf = xf.reshape(rows, lanes)
    yf = yf.reshape(rows, lanes)

    steps_total = rows // block_rows
    # Two independent chunks (own accumulator each) when the step count splits
    # evenly, so the leading "parallel" axis can use both TensorCores on v7x.
    num_chunks = 2 if (steps_total >= 2 and steps_total % 2 == 0) else 1
    steps_per_chunk = steps_total // num_chunks

    kernel = functools.partial(_charbonnier_kernel, eps=float(eps))

    partials = pl.pallas_call(
        kernel,
        out_shape=jax.ShapeDtypeStruct((num_chunks, 8, lanes), jnp.float32),
        grid_spec=pltpu.PrefetchScalarGridSpec(
            num_scalar_prefetch=0,
            grid=(num_chunks, steps_per_chunk),
            in_specs=[
                pl.BlockSpec((block_rows, lanes),
                             lambda c, i: (c * steps_per_chunk + i, 0)),
                pl.BlockSpec((block_rows, lanes),
                             lambda c, i: (c * steps_per_chunk + i, 0)),
            ],
            out_specs=pl.BlockSpec((1, 8, lanes), lambda c, i: (c, 0, 0)),
        ),
        compiler_params=pltpu.CompilerParams(
            dimension_semantics=("parallel", "arbitrary"),
        ),
    )(xf, yf)

    # Single epilogue cross-lane reduce over (num_chunks, 8, 128) partials.
    loss = jnp.sum(partials)
    # Padded elements (x == y == 0) each contribute exactly sqrt(eps).
    if n_pad:
        loss = loss - jnp.float32(n_pad) * jnp.sqrt(jnp.float32(eps))
    return loss


if __name__ == "__main__":
    key = jax.random.PRNGKey(0)
    kx, ky = jax.random.split(key)
    shape = (2, 4, 16, 16)  # NCHW, as in the PyTorch module
    x = jax.random.normal(kx, shape, dtype=jnp.float32)
    y = jax.random.normal(ky, shape, dtype=jnp.float32)

    loss = jax.block_until_ready(charbonnier_loss(x, y, eps=1e-6))

    # Reference check against plain JAX (matches torch.sum(sqrt(diff^2+eps))).
    diff = x - y
    ref = jnp.sum(jnp.sqrt(diff * diff + 1e-6))
    assert jnp.allclose(loss, ref, rtol=1e-5, atol=1e-5), (loss, ref)

    print("KERNEL_OK")
</pallas_src>

<mosaic_0001>
module attributes {stable_mosaic.version = 11 : i64} {
  func.func @_charbonnier_kernel(%arg0: i32, %arg1: i32, %arg2: memref<16x128xf32, #tpu.memory_space<vmem>>, %arg3: memref<16x128xf32, #tpu.memory_space<vmem>>, %arg4: memref<1x8x128xf32, #tpu.memory_space<vmem>>) attributes {dimension_semantics = [#tpu.dimension_semantics<parallel>, #tpu.dimension_semantics<arbitrary>], iteration_bounds = array<i64: 1, 1>, scalar_prefetch = 0 : i64, scratch_operands = 0 : i64, tpu.core_type = #tpu.core_type<tc>, window_params = [{transform_indices = @transform_0, window_bounds = array<i64: 16, 128>}, {transform_indices = @transform_1, window_bounds = array<i64: 16, 128>}, {transform_indices = @transform_2, window_bounds = array<i64: 1, 8, 128>}]} {
    %c0_i32 = arith.constant 0 : i32
    %0 = arith.cmpi eq, %arg1, %c0_i32 : i32
    %1 = arith.extui %0 : i1 to i32
    %c0_i32_0 = arith.constant 0 : i32
    %2 = arith.cmpi ne, %1, %c0_i32_0 : i32
    scf.if %2 {
      %cst_11 = arith.constant 0.000000e+00 : f32
      %16 = vector.broadcast %cst_11 : f32 to vector<1x8x128xf32>
      %c0_12 = arith.constant 0 : index
      %c0_13 = arith.constant 0 : index
      %c0_14 = arith.constant 0 : index
      %17 = vector.load %arg4[%c0_12, %c0_13, %c0_14] : memref<1x8x128xf32, #tpu.memory_space<vmem>>, vector<1x8x128xf32>
      tpu.vector_store %arg4[%c0_12, %c0_13, %c0_14], %16 {strides = array<i32>} : memref<1x8x128xf32, #tpu.memory_space<vmem>>, vector<1x8x128xf32>,
    } else {
    }
    %c0 = arith.constant 0 : index
    %c0_1 = arith.constant 0 : index
    %3 = vector.load %arg2[%c0, %c0_1] : memref<16x128xf32, #tpu.memory_space<vmem>>, vector<16x128xf32>
    %c0_2 = arith.constant 0 : index
    %c0_3 = arith.constant 0 : index
    %4 = vector.load %arg3[%c0_2, %c0_3] : memref<16x128xf32, #tpu.memory_space<vmem>>, vector<16x128xf32>
    %5 = arith.subf %3, %4 : vector<16x128xf32>
    %6 = arith.mulf %5, %5 : vector<16x128xf32>
    %cst = arith.constant 9.99999997E-7 : f32
    %7 = vector.broadcast %cst : f32 to vector<16x128xf32>
    %8 = arith.addf %6, %7 : vector<16x128xf32>
    %9 = math.sqrt %8 : vector<16x128xf32>
    %c0_4 = arith.constant 0 : index
    %c0_5 = arith.constant 0 : index
    %c0_6 = arith.constant 0 : index
    %10 = vector.load %arg4[%c0_4, %c0_5, %c0_6] : memref<1x8x128xf32, #tpu.memory_space<vmem>>, vector<1x8x128xf32>
    %11 = vector.shape_cast %9 : vector<16x128xf32> to vector<2x8x128xf32>
    %cst_7 = arith.constant dense<0.000000e+00> : vector<8x128xf32>
    %12 = vector.multi_reduction <add>, %11, %cst_7 [0] : vector<2x8x128xf32> to vector<8x128xf32>
    %13 = vector.shape_cast %12 : vector<8x128xf32> to vector<1x8x128xf32>
    %14 = arith.addf %10, %13 : vector<1x8x128xf32>
    %c0_8 = arith.constant 0 : index
    %c0_9 = arith.constant 0 : index
    %c0_10 = arith.constant 0 : index
    %15 = vector.load %arg4[%c0_8, %c0_9, %c0_10] : memref<1x8x128xf32, #tpu.memory_space<vmem>>, vector<1x8x128xf32>
    tpu.vector_store %arg4[%c0_8, %c0_9, %c0_10], %14 {strides = array<i32>} : memref<1x8x128xf32, #tpu.memory_space<vmem>>, vector<1x8x128xf32>,
    return
  }
  func.func @transform_0(%arg0: i32, %arg1: i32) -> (i32, i32) {
    %c1_i32 = arith.constant 1 : i32
    %0 = arith.muli %arg0, %c1_i32 : i32
    %1 = arith.addi %0, %arg1 : i32
    %c0_i32 = arith.constant 0 : i32
    %c0_i32_0 = arith.constant 0 : i32
    return %1, %c0_i32 : i32, i32
  }
  func.func @transform_1(%arg0: i32, %arg1: i32) -> (i32, i32) {
    %c1_i32 = arith.constant 1 : i32
    %0 = arith.muli %arg0, %c1_i32 : i32
    %1 = arith.addi %0, %arg1 : i32
    %c0_i32 = arith.constant 0 : i32
    %c0_i32_0 = arith.constant 0 : i32
    return %1, %c0_i32 : i32, i32
  }
  func.func @transform_2(%arg0: i32, %arg1: i32) -> (i32, i32, i32) {
    %c0_i32 = arith.constant 0 : i32
    %c0_i32_0 = arith.constant 0 : i32
    %c0_i32_1 = arith.constant 0 : i32
    return %arg0, %c0_i32, %c0_i32_0 : i32, i32, i32
  }
}

</mosaic_0001>

<bundles_post_ra>
// kernel: tpu_custom_call.1
= control target key start
LH: loop header
LB: loop body
LE: loop exit
PB: predicated region body
PF: predicated region fallthrough
CT: control target
= control target key end

     0   :  { %7 = vsyncpa [#allocation3], 0  ;;  %s206_s0 = inlined_call_operand.hbm [shape: f32[16,128], index: 0, kind: input, shape index: {}]   ;;  %s207_s1 = inlined_call_operand.hbm [shape: f32[16,128], index: 1, kind: input, shape index: {}]   ;;  %s208_s2 = inlined_call_operand.hbm [shape: f32[1,8,128], index: 2, kind: output, shape index: {}]  }
   0x1   :  { %8 = vsyncpa [#allocation6], 0 }
   0x2   :  { %9 = vsyncpa [#allocation4], 0  ;;  %s177_s9 = smov [#allocation2]  }
   0x3   :  { %s19_s10 = sshll.u32 %s177_s9, 4  ;;  %s20_s10 = int_to_ptr.vmem [resolvable:$true] %s19_s10 }
   0x4   :  { %s119_s11 = scalar_lea.vmem %s20_s10, 256  ;;  %p124_p1 = scmp.lt.s32.totalorder %s20_s10, %s20_s10 }
   0x5   :  { %p120_p0 = scmp.ne.s32.totalorder %s20_s10, %s119_s11  ;;  %p125_p2 = scmp.lt.s32.totalorder %s119_s11, %s119_s11 }
   0x7   :  { %p126_p3 = por %p125_p2, %p124_p1 }
   0x9   :  { %p127_p4 = pnand %p126_p3, %p120_p0 }
   0xb   :  { %130 = shalt.err (!%p127_p4)
}
   0xc   :  { %s178_s12 = smov 128   ;;  %s179_s13 = smov 8  }
   0xd   :  { %25 = dma.hbm_to_vmem [thread:$0]  %s206_s0, 256, %s20_s10, [#allocation3], %s178_s12, %s178_s12, %s179_s13  }
   0xe   :  { %s180_s16 = smov [#allocation5]  }
   0xf   :  { %s35_s17 = sshll.u32 %s180_s16, 4  ;;  %s36_s17 = int_to_ptr.vmem [resolvable:$true] %s35_s17 }
  0x10   :  { %s139_s18 = scalar_lea.vmem %s36_s17, 256  ;;  %p144_p6 = scmp.lt.s32.totalorder %s36_s17, %s36_s17 }
  0x11   :  { %p140_p5 = scmp.ne.s32.totalorder %s36_s17, %s139_s18  ;;  %p145_p7 = scmp.lt.s32.totalorder %s139_s18, %s139_s18 }
  0x13   :  { %p146_p8 = por %p145_p7, %p144_p6 }
  0x15   :  { %p147_p9 = pnand %p146_p8, %p140_p5 }
  0x17   :  { %150 = shalt.err (!%p147_p9)
}
  0x18   :  { %41 = dma.hbm_to_vmem [thread:$0]  %s207_s1, 256, %s36_s17, [#allocation6], %s178_s12, %s178_s12, %s179_s13  }
  0x19   :  { %171 = dma.done.wait [#allocation3], 256  }
  0x1a   :  { %172 = vsyncadd [#allocation3], 4294967040 }
  0x1b   :  { %173 = dma.done.wait [#allocation6], 256  }
  0x1c   :  { %174 = vsyncadd [#allocation6], 4294967040  ;;  %v57_v0 = vld [vmem:[#allocation2] sm:$0xff]  ;;  %v58_v1 = vld [vmem:[#allocation2 + $0x8] sm:$0xff]  ;;  %s181_s0 = smov [#allocation7]  }
  0x1d   :  { %v59_v2 = vld [vmem:[#allocation5] sm:$0xff]  ;;  %v60_v3 = vld [vmem:[#allocation5 + $0x8] sm:$0xff]  ;;  %s91_s1 = sshll.u32 %s181_s0, 4  ;;  %s92_s1 = int_to_ptr.vmem [resolvable:$true] %s91_s1 }
  0x1e   :  { %v61_v4 = vsub.f32 %v57_v0, %v59_v2  ;;  %v62_v5 = vsub.f32 %v58_v1, %v60_v3  ;;  %s151_s21 = scalar_lea.vmem %s92_s1, 128  ;;  %p156_p11 = scmp.lt.s32.totalorder %s92_s1, %s92_s1 }
  0x1f   :  { %p152_p10 = scmp.ne.s32.totalorder %s92_s1, %s151_s21  ;;  %p157_p12 = scmp.lt.s32.totalorder %s151_s21, %s151_s21 }
  0x20   :  { %v63_v6 = vmul.f32 %v61_v4, %v61_v4  ;;  %v64_v7 = vmul.f32 %v62_v5, %v62_v5 }
  0x21   :  { %p158_p13 = por %p157_p12, %p156_p11 }
  0x22   :  { %v65_v8 = vadd.f32 1e-06, %v63_v6  ;;  %v66_v9 = vadd.f32 1e-06, %v64_v7 }
  0x23   :  { %p159_p0 = pnand %p158_p13, %p152_p10 }
  0x24   :  { %107 = vrsqrt.f32 %v65_v8  ;;  %vm69_vm0 = vcmp.eq.f32.partialorder %v65_v8, inf  ;;  %v72_v11 = vand.u32 2147483648, %v65_v8  ;;  %vm71_vm1 = vcmp.eq.f32.partialorder %v65_v8, 0.0 }
  0x25   :  { %109 = vrsqrt.f32 %v66_v9  ;;  %vm76_vm2 = vcmp.eq.f32.partialorder %v66_v9, inf  ;;  %v79_v14 = vand.u32 2147483648, %v66_v9  ;;  %vm78_vm3 = vcmp.eq.f32.partialorder %v66_v9, 0.0 }
  0x31   :  { %v108_v10 = vpop.eup %107 }
  0x32   :  { %v110_v12 = vpop.eup %109  ;;  %v68_v13 = vmul.f32 %v108_v10, %v65_v8 }
  0x33   :  { %v75_v15 = vmul.f32 %v110_v12, %v66_v9 }
  0x34   :  { %v70_v16 = vsel %vm69_vm0, %v65_v8, %v68_v13 }
  0x35   :  { %v73_v17 = vsel %vm71_vm1, %v72_v11, %v70_v16  ;;  %v77_v18 = vsel %vm76_vm2, %v66_v9, %v75_v15 }
  0x36   :  { %v80_v19 = vsel %vm78_vm3, %v79_v14, %v77_v18 }
  0x37   :  { %v82_v20 = vadd.f32 %v80_v19, %v73_v17 }
  0x39   :  { %84 = vst [vmem:[#allocation7] sm:$0xff] %v82_v20 }
  0x3a   :  { %162 = shalt.err (!%p159_p0)
}
  0x3b   :  { %94 = dma.vmem_to_hbm [thread:$0]  %s92_s1, 128, %s208_s2, [#allocation4]  }
  0x3c   :  { %175 = dma.done.wait [#allocation4], 128  }
  0x3d   :  { %176 = vsyncadd [#allocation4], 4294967168 }
  0x3e   :  { %98 = vsyncpa [#allocation3], 1 }
  0x3f   :  { %99 = vsyncpa [#allocation6], 1 }
  0x40   :  { %100 = vsyncpa [#allocation4], 1 }

</bundles_post_ra>
